<compile_context>
chip_gen: v7x
topology: tpu7x:2x2x1
jax: 0.10.0
libtpu: 0.0.40
codegen_flags: <defaults>
</compile_context>

<pallas_src>
import functools

import jax
import jax.numpy as jnp
from jax.experimental import pallas as pl
from jax.experimental.pallas import tpu as pltpu


def _distill_loss_kernel(logits_ref, targets_ref, *rest, tile_b, true_b,
                         use_dist, needs_mask, use_mxu_reduce):
    if use_dist:
        tlogits_ref, out_ref = rest
    else:
        (out_ref,) = rest

    logits = logits_ref[...].astype(jnp.float32)          # (TB, C)
    targets = targets_ref[...]                            # (TB, 1) int32
    tb, c = logits.shape

    def row_sum(x):
        # Lane-reduce: MXU dot-with-ones when C is lane-dense (frees XLU/VPU
        # slots, relevant on v7x), plain jnp.sum otherwise.
        if use_mxu_reduce:
            ones_col = jnp.ones((c, 1), jnp.float32)
            return jnp.dot(x, ones_col, preferred_element_type=jnp.float32)
        return jnp.sum(x, axis=-1, keepdims=True)

    # --- Cross entropy per row: numerically stable log-sum-exp ---
    row_max = jnp.max(logits, axis=-1, keepdims=True)                       # (TB, 1)
    lse = jnp.log(row_sum(jnp.exp(logits - row_max))) + row_max             # (TB, 1)
    cls_ids = jax.lax.broadcasted_iota(jnp.int32, (tb, c), 1)               # (TB, C)
    tgt_logit = row_sum(jnp.where(cls_ids == targets, logits, 0.0))         # (TB, 1)
    ce_rows = lse - tgt_logit                                               # (TB, 1)

    # --- Squared L2 distance per row (only when alpha < 1) ---
    if use_dist:
        diff = logits - tlogits_ref[...].astype(jnp.float32)
        d_rows = row_sum(diff * diff)                                       # (TB, 1)

    # Mask rows past the true batch size (only emitted for partial last tile).
    if needs_mask:
        row_ids = pl.program_id(0) * tile_b + jax.lax.broadcasted_iota(
            jnp.int32, (tb, 1), 0)
        valid = row_ids < true_b
        ce_rows = jnp.where(valid, ce_rows, 0.0)
        if use_dist:
            d_rows = jnp.where(valid, d_rows, 0.0)

    ce_partial = jnp.sum(ce_rows)
    dist_partial = jnp.sum(d_rows) if use_dist else jnp.float32(0.0)

    # Lane-dense (8,128) output block: row 0 lane 0 = CE partial, lane 1 = dist.
    lane = jax.lax.broadcasted_iota(jnp.int32, (1, 128), 1)
    row0 = jnp.where(lane == 0, ce_partial,
                     jnp.where(lane == 1, dist_partial, 0.0)).astype(jnp.float32)
    out_ref[...] = jnp.zeros((8, 128), jnp.float32)
    out_ref[0:1, :] = row0


def _vmem_budget_and_phys():
    """Generation-aware (input + temporaries) VMEM budget and physical capacity."""
    phys = 128 * 1024 * 1024
    try:
        phys = int(pltpu.get_tpu_info().vmem_capacity_bytes)
    except Exception:
        pass
    # ~3/8 of physical: 24 MiB on v7x (64 MiB), 48 MiB cap on v5e/v6e (128 MiB).
    budget = min(phys * 3 // 8, 48 * 1024 * 1024)
    return budget, phys


def classification_distill_loss(logits, targets, targetlogits=None, alpha=0.5,
                                tile_b=None, vmem_budget_bytes=None):
    """Pallas implementation of ClassificationDistillLoss.forward (reduction='mean')."""
    b, c = logits.shape
    alpha = float(alpha)
    use_dist = alpha < 1.0            # static branch, mirrors torch `if alpha < 1`
    if use_dist and targetlogits is None:
        raise ValueError("targetlogits is required when alpha < 1")

    targets2d = targets.reshape(b, 1).astype(jnp.int32)

    itemsize = jnp.dtype(logits.dtype).itemsize
    n_streams = 2 if use_dist else 1
    sublane = max(8, 32 // itemsize)          # 8 for f32, 16 for bf16, 32 for int8

    budget, phys = _vmem_budget_and_phys()
    if vmem_budget_bytes is not None:
        budget = int(vmem_budget_bytes)

    if tile_b is None:
        # Per-row VMEM bytes: double-buffered logit stream(s) + lane-padded
        # (tb,1) int32 targets buffers + ~4 full-tile f32 temporaries.
        per_row = 2 * (n_streams * c * itemsize + 128 * 4) + 4 * c * 4
        tb = max(sublane, ((budget // per_row) // sublane) * sublane)
    else:
        tb = max(sublane, (int(tile_b) // sublane) * sublane)
    if tb >= b:
        tb = b                        # single full-extent block (any row count ok)

    num_tiles = -(-b // tb)
    needs_mask = (b % tb) != 0
    use_mxu_reduce = 128 <= c <= 32768

    # Explicit VMEM limit with headroom over the estimated footprint.
    est = (2 * (n_streams * tb * c * itemsize + tb * 128 * 4)
           + 2 * 8 * 128 * 4
           + 4 * tb * c * 4)
    vmem_limit = int(max(32 * 1024 * 1024,
                         min(phys - (4 << 20), 2 * est + (8 << 20))))

    in_specs = [
        pl.BlockSpec((tb, c), lambda i: (i, 0)),      # student logits
        pl.BlockSpec((tb, 1), lambda i: (i, 0)),      # targets (int32)
    ]
    args = [logits, targets2d]
    if use_dist:
        in_specs.append(pl.BlockSpec((tb, c), lambda i: (i, 0)))   # teacher logits
        args.append(targetlogits)

    kernel = functools.partial(_distill_loss_kernel, tile_b=tb, true_b=b,
                               use_dist=use_dist, needs_mask=needs_mask,
                               use_mxu_reduce=use_mxu_reduce)

    bytes_accessed = n_streams * b * c * itemsize + b * 4 + num_tiles * 8 * 128 * 4
    cost = pl.CostEstimate(flops=(9 if use_dist else 6) * b * c,
                           transcendentals=b * c,
                           bytes_accessed=bytes_accessed)

    partials = pl.pallas_call(
        kernel,
        out_shape=jax.ShapeDtypeStruct((num_tiles * 8, 128), jnp.float32),
        grid=(num_tiles,),
        in_specs=in_specs,
        out_specs=pl.BlockSpec((8, 128), lambda i: (i, 0)),
        compiler_params=pltpu.CompilerParams(
            dimension_semantics=("parallel",),
            vmem_limit_bytes=vmem_limit),
        cost_estimate=cost,
    )(*args)

    partials = partials.reshape(num_tiles, 8, 128)
    celoss = jnp.sum(partials[:, 0, 0]) / b
    ret = alpha * celoss
    if use_dist:
        ret = ret + (1.0 - alpha) * (jnp.sum(partials[:, 0, 1]) / b)
    return ret


def _reference_loss(logits, targets, targetlogits, alpha=0.5):
    """Pure-JAX reference matching the torch module's semantics."""
    logits = logits.astype(jnp.float32)
    logprobs = jax.nn.log_softmax(logits, axis=-1)
    ce = -jnp.take_along_axis(logprobs, targets[:, None], axis=-1)[:, 0]
    celoss = jnp.mean(ce)
    ret = alpha * celoss
    if alpha < 1:
        dist = jnp.mean(jnp.sum(
            (logits - targetlogits.astype(jnp.float32)) ** 2, axis=-1))
        ret = ret + (1.0 - alpha) * dist
    return ret


if __name__ == "__main__":
    key = jax.random.PRNGKey(0)
    k1, k2, k3 = jax.random.split(key, 3)

    # 1) Lane-dense classes (MXU-reduce path), alpha < 1 (CE + distill distance).
    B, C = 64, 128
    logits = jax.random.normal(k1, (B, C), dtype=jnp.float32)
    targetlogits = jax.random.normal(k2, (B, C), dtype=jnp.float32)
    targets = jax.random.randint(k3, (B,), 0, C, dtype=jnp.int32)

    out = jax.block_until_ready(
        classification_distill_loss(logits, targets, targetlogits, alpha=0.5))
    ref = _reference_loss(logits, targets, targetlogits, alpha=0.5)
    assert jnp.allclose(out, ref, rtol=1e-5, atol=1e-5), (out, ref)

    # 2) alpha == 1: hard CE only; teacher-logit stream statically dropped.
    out1 = jax.block_until_ready(
        classification_distill_loss(logits, targets, targetlogits, alpha=1.0))
    ref1 = _reference_loss(logits, targets, targetlogits, alpha=1.0)
    assert jnp.allclose(out1, ref1, rtol=1e-5, atol=1e-5), (out1, ref1)

    # 3) Partial-tile masking path (B % tile_b != 0) + small C (VPU-reduce path).
    B2, C2 = 70, 16
    l2 = jax.random.normal(k1, (B2, C2), dtype=jnp.float32)
    t2 = jax.random.normal(k2, (B2, C2), dtype=jnp.float32)
    y2 = jax.random.randint(k3, (B2,), 0, C2, dtype=jnp.int32)
    out2 = jax.block_until_ready(
        classification_distill_loss(l2, y2, t2, alpha=0.3, tile_b=32))
    ref2 = _reference_loss(l2, y2, t2, alpha=0.3)
    assert jnp.allclose(out2, ref2, rtol=1e-5, atol=1e-5), (out2, ref2)

    # 4) bf16 logit streams (halved HBM traffic); kernel upcasts per tile.
    lb = logits.astype(jnp.bfloat16)
    tlb = targetlogits.astype(jnp.bfloat16)
    out3 = jax.block_until_ready(
        classification_distill_loss(lb, targets, tlb, alpha=0.5))
    ref3 = _reference_loss(lb, targets, tlb, alpha=0.5)
    assert jnp.allclose(out3, ref3, rtol=1e-4, atol=1e-4), (out3, ref3)

    print("KERNEL_OK")
</pallas_src>

<mosaic_0001>
module attributes {stable_mosaic.version = 11 : i64} {
  func.func @_distill_loss_kernel(%arg0: i32, %arg1: memref<64x128xf32, #tpu.memory_space<vmem>>, %arg2: memref<64x1xi32, #tpu.memory_space<vmem>>, %arg3: memref<64x128xf32, #tpu.memory_space<vmem>>, %arg4: memref<8x128xf32, #tpu.memory_space<vmem>>) attributes {dimension_semantics = [#tpu.dimension_semantics<parallel>], iteration_bounds = array<i64: 1>, scalar_prefetch = 0 : i64, scratch_operands = 0 : i64, tpu.core_type = #tpu.core_type<tc>, window_params = [{transform_indices = @transform_0, window_bounds = array<i64: 64, 128>}, {transform_indices = @transform_1, window_bounds = array<i64: 64, 1>}, {transform_indices = @transform_2, window_bounds = array<i64: 64, 128>}, {transform_indices = @transform_3, window_bounds = array<i64: 8, 128>}]} {
    %c0 = arith.constant 0 : index
    %c0_0 = arith.constant 0 : index
    %0 = vector.load %arg1[%c0, %c0_0] : memref<64x128xf32, #tpu.memory_space<vmem>>, vector<64x128xf32>
    %c0_1 = arith.constant 0 : index
    %c0_2 = arith.constant 0 : index
    %1 = vector.load %arg2[%c0_1, %c0_2] : memref<64x1xi32, #tpu.memory_space<vmem>>, vector<64x1xi32>
    %cst = arith.constant dense<0xFF800000> : vector<64xf32>
    %2 = vector.multi_reduction <maximumf>, %0, %cst [1] : vector<64x128xf32> to vector<64xf32>
    %3 = vector.shape_cast %2 : vector<64xf32> to vector<64x1xf32>
    %4 = vector.broadcast %3 : vector<64x1xf32> to vector<64x128xf32>
    %5 = arith.subf %0, %4 : vector<64x128xf32>
    %6 = math.exp %5 : vector<64x128xf32>
    %cst_3 = arith.constant 1.000000e+00 : f32
    %7 = vector.broadcast %cst_3 : f32 to vector<128x1xf32>
    %cst_4 = arith.constant dense<0.000000e+00> : vector<64x1xf32>
    %8 = tpu.matmul %6, %7, %cst_4 {dimension_numbers = #tpu.dot_dimension_numbers<[1], [0], [0], [1], [0, 0, 1, 1], [], []>} : vector<64x128xf32>, vector<128x1xf32>, vector<64x1xf32> -> vector<64x1xf32>
    %9 = math.log %8 : vector<64x1xf32>
    %10 = arith.addf %9, %3 : vector<64x1xf32>
    %11 = tpu.iota {dimensions = array<i32: 1>} : vector<64x128xi32>
    %12 = vector.broadcast %1 : vector<64x1xi32> to vector<64x128xi32>
    %13 = arith.cmpi eq, %11, %12 : vector<64x128xi32>
    %cst_5 = arith.constant 0.000000e+00 : f32
    %14 = vector.broadcast %cst_5 : f32 to vector<64x128xf32>
    %15 = arith.select %13, %0, %14 : vector<64x128xi1>, vector<64x128xf32>
    %cst_6 = arith.constant 1.000000e+00 : f32
    %16 = vector.broadcast %cst_6 : f32 to vector<128x1xf32>
    %cst_7 = arith.constant dense<0.000000e+00> : vector<64x1xf32>
    %17 = tpu.matmul %15, %16, %cst_7 {dimension_numbers = #tpu.dot_dimension_numbers<[1], [0], [0], [1], [0, 0, 1, 1], [], []>} : vector<64x128xf32>, vector<128x1xf32>, vector<64x1xf32> -> vector<64x1xf32>
    %18 = arith.subf %10, %17 : vector<64x1xf32>
    %c0_8 = arith.constant 0 : index
    %c0_9 = arith.constant 0 : index
    %19 = vector.load %arg3[%c0_8, %c0_9] : memref<64x128xf32, #tpu.memory_space<vmem>>, vector<64x128xf32>
    %20 = arith.subf %0, %19 : vector<64x128xf32>
    %21 = arith.mulf %20, %20 : vector<64x128xf32>
    %cst_10 = arith.constant 1.000000e+00 : f32
    %22 = vector.broadcast %cst_10 : f32 to vector<128x1xf32>
    %cst_11 = arith.constant dense<0.000000e+00> : vector<64x1xf32>
    %23 = tpu.matmul %21, %22, %cst_11 {dimension_numbers = #tpu.dot_dimension_numbers<[1], [0], [0], [1], [0, 0, 1, 1], [], []>} : vector<64x128xf32>, vector<128x1xf32>, vector<64x1xf32> -> vector<64x1xf32>
    %24 = vector.shape_cast %18 : vector<64x1xf32> to vector<1x64x1xf32>
    %cst_12 = arith.constant dense<0.000000e+00> : vector<1xf32>
    %25 = vector.multi_reduction <add>, %24, %cst_12 [1, 2] : vector<1x64x1xf32> to vector<1xf32>
    %26 = vector.shape_cast %25 : vector<1xf32> to vector<1x1x1xf32>
    %27 = vector.extract %26[0, 0, 0] : f32 from vector<1x1x1xf32>
    %28 = vector.shape_cast %23 : vector<64x1xf32> to vector<1x64x1xf32>
    %cst_13 = arith.constant dense<0.000000e+00> : vector<1xf32>
    %29 = vector.multi_reduction <add>, %28, %cst_13 [1, 2] : vector<1x64x1xf32> to vector<1xf32>
    %30 = vector.shape_cast %29 : vector<1xf32> to vector<1x1x1xf32>
    %31 = vector.extract %30[0, 0, 0] : f32 from vector<1x1x1xf32>
    %32 = tpu.iota {dimensions = array<i32: 1>} : vector<1x128xi32>
    %c0_i32 = arith.constant 0 : i32
    %33 = vector.broadcast %c0_i32 : i32 to vector<1x128xi32>
    %34 = arith.cmpi eq, %32, %33 : vector<1x128xi32>
    %c1_i32 = arith.constant 1 : i32
    %35 = vector.broadcast %c1_i32 : i32 to vector<1x128xi32>
    %36 = arith.cmpi eq, %32, %35 : vector<1x128xi32>
    %cst_14 = arith.constant 0.000000e+00 : f32
    %37 = vector.broadcast %31 : f32 to vector<1x128xf32>
    %38 = vector.broadcast %cst_14 : f32 to vector<1x128xf32>
    %39 = arith.select %36, %37, %38 : vector<1x128xi1>, vector<1x128xf32>
    %40 = vector.broadcast %27 : f32 to vector<1x128xf32>
    %41 = arith.select %34, %40, %39 : vector<1x128xi1>, vector<1x128xf32>
    %cst_15 = arith.constant 0.000000e+00 : f32
    %42 = vector.broadcast %cst_15 : f32 to vector<8x128xf32>
    %c0_16 = arith.constant 0 : index
    %c0_17 = arith.constant 0 : index
    %43 = vector.load %arg4[%c0_16, %c0_17] : memref<8x128xf32, #tpu.memory_space<vmem>>, vector<8x128xf32>
    tpu.vector_store %arg4[%c0_16, %c0_17], %42 {strides = array<i32>} : memref<8x128xf32, #tpu.memory_space<vmem>>, vector<8x128xf32>,
    %c0_18 = arith.constant 0 : index
    %c0_19 = arith.constant 0 : index
    %44 = vector.load %arg4[%c0_18, %c0_19] : memref<8x128xf32, #tpu.memory_space<vmem>>, vector<1x128xf32>
    tpu.vector_store %arg4[%c0_18, %c0_19], %41 {strides = array<i32>} : memref<8x128xf32, #tpu.memory_space<vmem>>, vector<1x128xf32>,
    return
  }
  func.func @transform_0(%arg0: i32) -> (i32, i32) {
    %c0_i32 = arith.constant 0 : i32
    %c0_i32_0 = arith.constant 0 : i32
    return %arg0, %c0_i32 : i32, i32
  }
  func.func @transform_1(%arg0: i32) -> (i32, i32) {
    %c0_i32 = arith.constant 0 : i32
    %c0_i32_0 = arith.constant 0 : i32
    return %arg0, %c0_i32 : i32, i32
  }
  func.func @transform_2(%arg0: i32) -> (i32, i32) {
    %c0_i32 = arith.constant 0 : i32
    %c0_i32_0 = arith.constant 0 : i32
    return %arg0, %c0_i32 : i32, i32
  }
  func.func @transform_3(%arg0: i32) -> (i32, i32) {
    %c0_i32 = arith.constant 0 : i32
    %c0_i32_0 = arith.constant 0 : i32
    return %arg0, %c0_i32 : i32, i32
  }
}

</mosaic_0001>

<bundles_post_ra>
// kernel: tpu_custom_call.1
= control target key start
LH: loop header
LB: loop body
LE: loop exit
PB: predicated region body
PF: predicated region fallthrough
CT: control target
= control target key end

     0   :  { %8 = vsyncpa [#allocation3], 0  ;;  %s1210_s0 = inlined_call_operand.vmem [shape: f32[64,128], index: 0, kind: input, shape index: {}]   ;;  %s1211_s1 = inlined_call_operand.vmem [shape: s32[64,1], index: 1, kind: input, shape index: {}]   ;;  %s1212_s2 = inlined_call_operand.hbm [shape: f32[64,128], index: 2, kind: input, shape index: {}]   ;;  %s1213_s3 = inlined_call_operand.hbm [shape: f32[8,128], index: 3, kind: output, shape index: {}]  }
   0x1   :  { %9 = vsyncpa [#allocation4], 0  ;;  %s939_s12 = smov [#allocation2]   ;;  %s891_s16 = scalar_lea.hbm %s1212_s2, 1024 }
   0x2   :  { %s19_s13 = sshll.u32 %s939_s12, 4  ;;  %p892_p0 = scmp.ne.s32.totalorder %s1212_s2, %s891_s16  ;;  %s20_s13 = int_to_ptr.vmem [resolvable:$true] %s19_s13 }
   0x3   :  { %p895_p1 = scmp.lt.u32.totalorder %s891_s16, %s1212_s2 }
   0x5   :  { %p897_p2 = pnand %p895_p1, %p892_p0 }
   0x7   :  { %900 = shalt.err (!%p897_p2)
}
   0x8   :  { %s901_s21 = scalar_lea.vmem %s20_s13, 1024  ;;  %p906_p4 = scmp.lt.s32.totalorder %s20_s13, %s20_s13 }
   0x9   :  { %p902_p3 = scmp.ne.s32.totalorder %s20_s13, %s901_s21  ;;  %p907_p5 = scmp.lt.s32.totalorder %s901_s21, %s901_s21 }
   0xb   :  { %p908_p6 = por %p907_p5, %p906_p4 }
   0xd   :  { %p909_p7 = pnand %p908_p6, %p902_p3 }
   0xf   :  { %912 = shalt.err (!%p909_p7)
}
  0x10   :  { %s940_s22 = smov 128   ;;  %s941_s23 = smov 8  }
  0x11   :  { %25 = dma.hbm_to_vmem [thread:$0]  %s1212_s2, 1024, %s20_s13, [#allocation3], %s940_s22, %s940_s22, %s941_s23  }
  0x12   :  { %935 = dma.done.wait [#allocation3], 1024  }
  0x13   :  { %936 = vsyncadd [#allocation3], 4294966272  ;;  %v942_v0 = vmov 0   ;;  %v943_v1 = vmov 1.0|1.0   ;;  %v987_v2 = vld [vmem:[%s1210_s0 + $0x10] sm:$0xff]  ;;  %v214_v38 = vlaneseq }
  0x14   :  { %858 = vset.pattern.permute.xlu1 %v942_v0  ;;  %857 = vset.pattern.permute.xlu0 %v942_v0  ;;  %v992_v3 = vld [vmem:[%s1210_s0] sm:$0xff]  ;;  %v1001_v4 = vld [vmem:[%s1210_s0 + $0x18] sm:$0xff]  ;;  %v1006_v5 = vld [vmem:[%s1210_s0 + $0x8] sm:$0xff]  ;;  %vm498_vm8 = vcmask 7168   ;;  %s945_s28 = smov [#allocation5]  }
  0x15   :  { %782 = vmatprep.subr.bf16.mxu0 %v943_v1  ;;  %798 = vmatprep.subr.bf16.mxu1 %v943_v1  ;;  %v1017_v6 = vld [vmem:[%s1210_s0 + $0x28] sm:$0xff]  ;;  %v1022_v7 = vld [vmem:[%s1210_s0 + $0x20] sm:$0xff]  ;;  %v1033_v8 = vld [vmem:[%s1210_s0 + $0x38] sm:$0xff]  ;;  %v1116_v44 = vand.u32 127, %v214_v38  ;;  %s561_s29 = sshll.u32 %s945_s28, 4  ;;  %s562_s29 = int_to_ptr.vmem [resolvable:$true] %s561_s29 }
  0x16   :  { %783 = vmatpush3.bf16.msra.mxu0 %v943_v1  ;;  %799 = vmatpush3.bf16.msra.mxu1 %v943_v1  ;;  %v1038_v9 = vld [vmem:[%s1210_s0 + $0x30] sm:$0xff]  ;;  %v38_v10 = vld [vmem:[%s1211_s1 + $0x8] sm:$0xff]  ;;  %v37_v12 = vld [vmem:[%s1211_s1] sm:$0xff]  ;;  %s913_s4 = scalar_lea.vmem %s562_s29, 128  ;;  %p918_p9 = scmp.lt.s32.totalorder %s562_s29, %s562_s29 }
  0x17   :  { %784 = vmatprep.subr.bf16.mxu0 %v943_v1  ;;  %800 = vmatprep.subr.bf16.mxu1 %v943_v1  ;;  %v39_v11 = vld [vmem:[%s1211_s1 + $0x10] sm:$0xff]  ;;  %v40_v13 = vld [vmem:[%s1211_s1 + $0x18] sm:$0xff]  ;;  %v41_v14 = vld [vmem:[%s1211_s1 + $0x20] sm:$0xff]  ;;  %vm548_vm9 = vcmp.eq.s32.totalorder %v1116_v44, 1  ;;  %vm547_vm10 = vcmp.eq.s32.totalorder %v1116_v44, 0  ;;  %p914_p8 = scmp.ne.s32.totalorder %s562_s29, %s913_s4  ;;  %p919_p10 = scmp.lt.s32.totalorder %s913_s4, %s913_s4 }
  0x18   :  { %49 = vmax.xlane.f32.xlu1 %v987_v2  ;;  %45 = vmax.xlane.f32.xlu0 %v992_v3  ;;  %v42_v15 = vld [vmem:[%s1211_s1 + $0x28] sm:$0xff]  ;;  %v43_v16 = vld [vmem:[%s1211_s1 + $0x30] sm:$0xff]  ;;  %v44_v17 = vld [vmem:[%s1211_s1 + $0x38] sm:$0xff] }
  0x19   :  { %v369_v53 = vld [vmem:[#allocation2] sm:$0xff]  ;;  %p920_p11 = por %p919_p10, %p918_p9 }
  0x1a   :  { %785 = vmatpush3.bf16.msra.mxu0 %v943_v1  ;;  %801 = vmatpush3.bf16.msra.mxu1 %v943_v1  ;;  %v377_v57 = vsub.f32 %v992_v3, %v369_v53  ;;  %v373_v61 = vld [vmem:[#allocation2 + $0x20] sm:$0xff] }
  0x1b   :  { %786 = vmatprep.subr.bf16.mxu0 %v943_v1  ;;  %802 = vmatprep.subr.bf16.mxu1 %v943_v1  ;;  %v381_v63 = vsub.f32 %v1022_v7, %v373_v61  ;;  %p921_p12 = pnand %p920_p11, %p914_p8 }
  0x1c   :  { %51 = vmax.xlane.f32.xlu1 %v1001_v4  ;;  %47 = vmax.xlane.f32.xlu0 %v1006_v5  ;;  %v385_v60 = vmul.f32 %v377_v57, %v377_v57 }
  0x1e   :  { %787 = vmatpush3.bf16.msra.mxu0 %v943_v1  ;;  %803 = vmatpush3.bf16.msra.mxu1 %v943_v1 }
  0x1f   :  { %788 = vmatprep.subr.bf16.mxu0 %v943_v1  ;;  %804 = vmatprep.subr.bf16.mxu1 %v943_v1 }
  0x20   :  { %55 = vmax.xlane.f32.xlu1 %v1017_v6  ;;  %53 = vmax.xlane.f32.xlu0 %v1022_v7 }
  0x22   :  { %789 = vmatpush3.bf16.msra.mxu0 %v943_v1  ;;  %805 = vmatpush3.bf16.msra.mxu1 %v943_v1 }
  0x23   :  { %790 = vmatprep.subr.bf16.mxu0 %v943_v1  ;;  %806 = vmatprep.subr.bf16.mxu1 %v943_v1 }
  0x24   :  { %59 = vmax.xlane.f32.xlu1 %v1033_v8  ;;  %57 = vmax.xlane.f32.xlu0 %v1038_v9 }
  0x26   :  { %791 = vmatpush3.bf16.msra.mxu0 %v943_v1  ;;  %807 = vmatpush3.bf16.msra.mxu1 %v943_v1 }
  0x27   :  { %792 = vmatprep.subr.bf16.mxu0 %v943_v1  ;;  %808 = vmatprep.subr.bf16.mxu1 %v943_v1 }
  0x2a   :  { %793 = vmatpush3.bf16.msra.mxu0 %v943_v1  ;;  %809 = vmatpush3.bf16.msra.mxu1 %v943_v1 }
  0x2b   :  { %794 = vmatprep.subr.bf16.mxu0 %v943_v1  ;;  %810 = vmatprep.subr.bf16.mxu1 %v943_v1 }
  0x2e   :  { %795 = vmatpush3.bf16.msra.mxu0 %v943_v1  ;;  %811 = vmatpush3.bf16.msra.mxu1 %v943_v1 }
  0x2f   :  { %796 = vmatprep.subr.bf16.mxu0 %v943_v1  ;;  %812 = vmatprep.subr.bf16.mxu1 %v943_v1 }
  0x32   :  { %797 = vmatpush3.bf16.msra.mxu0 %v943_v1  ;;  %813 = vmatpush3.bf16.msra.mxu1 %v943_v1 }
  0x33   :  { %814 = vmatprep.subr.bf16.mxu0 %v943_v1  ;;  %830 = vmatprep.subr.bf16.mxu1 %v943_v1 }
  0x35   :  { %220 = vperm.xlu1 %858, %v38_v10   ;;  %v370_v10 = vld [vmem:[#allocation2 + $0x8] sm:$0xff] }
  0x39   :  { %223 = vperm.xlu1 %858, %v39_v11   ;;  %v378_v11 = vsub.f32 %v1006_v5, %v370_v10 }
  0x3a   :  { %217 = vperm.xlu0 %857, %v37_v12   ;;  %v374_v12 = vld [vmem:[#allocation2 + $0x28] sm:$0xff] }
  0x3d   :  { %226 = vperm.xlu1 %858, %v40_v13  }
  0x41   :  { %229 = vperm.xlu1 %858, %v41_v14   ;;  %v372_v14 = vld [vmem:[#allocation2 + $0x18] sm:$0xff] }
  0x45   :  { %232 = vperm.xlu1 %858, %v42_v15   ;;  %v375_v15 = vld [vmem:[#allocation2 + $0x30] sm:$0xff] }
  0x49   :  { %235 = vperm.xlu1 %858, %v43_v16   ;;  %v382_v16 = vsub.f32 %v1017_v6, %v374_v12 }
  0x4d   :  { %238 = vperm.xlu1 %858, %v44_v17   ;;  %v386_v17 = vmul.f32 %v378_v11, %v378_v11 }
  0xa5   :  { %v1084_v18 = vpop.xlane.xlu1 %49  ;;  %v1086_v19 = vpop.xlane.xlu0 %45 }
  0xa6   :  { %v63_v20 = vsub.f32 %v987_v2, %v1084_v18  ;;  %v61_v21 = vsub.f32 %v992_v3, %v1086_v19 }
  0xa8   :  { %v69_v22 = vmul.f32 1.442695, %v61_v21  ;;  %v73_v25 = vmul.f32 1.442695, %v63_v20  ;;  %v383_v20 = vsub.f32 %v1038_v9, %v375_v15  ;;  %v376_v21 = vld [vmem:[#allocation2 + $0x38] sm:$0xff] }
  0xa9   :  { %v1092_v23 = vpop.xlane.xlu1 %51  ;;  %v1094_v24 = vpop.xlane.xlu0 %47 }
  0xaa   :  { %v64_v26 = vsub.f32 %v1001_v4, %v1092_v23  ;;  %v62_v27 = vsub.f32 %v1006_v5, %v1094_v24  ;;  %859 = vpow2.f32 %v69_v22 }
  0xab   :  { %861 = vpow2.f32 %v73_v25  ;;  %v384_v25 = vsub.f32 %v1033_v8, %v376_v21 }
  0xac   :  { %v71_v28 = vmul.f32 1.442695, %v62_v27  ;;  %v75_v29 = vmul.f32 1.442695, %v64_v26  ;;  %v391_v26 = vmul.f32 %v383_v20, %v383_v20 }
  0xad   :  { %v1100_v30 = vpop.xlane.xlu1 %55  ;;  %v1102_v31 = vpop.xlane.xlu0 %53  ;;  %v392_v27 = vmul.f32 %v384_v25, %v384_v25 }
  0xae   :  { %v66_v32 = vsub.f32 %v1017_v6, %v1100_v30  ;;  %v65_v33 = vsub.f32 %v1022_v7, %v1102_v31  ;;  %863 = vpow2.f32 %v71_v28 }
  0xaf   :  { %865 = vpow2.f32 %v75_v29 }
  0xb0   :  { %v77_v34 = vmul.f32 1.442695, %v65_v33  ;;  %v79_v35 = vmul.f32 1.442695, %v66_v32 }
  0xb1   :  { %v1108_v36 = vpop.xlane.xlu1 %59  ;;  %v1110_v37 = vpop.xlane.xlu0 %57 }
  0xb2   :  { %v68_v39 = vsub.f32 %v1033_v8, %v1108_v36  ;;  %v67_v40 = vsub.f32 %v1038_v9, %v1110_v37  ;;  %867 = vpow2.f32 %v77_v34 }
  0xb3   :  { %869 = vpow2.f32 %v79_v35 }
  0xb4   :  { %v81_v41 = vmul.f32 1.442695, %v67_v40  ;;  %v860_v42 = vpop.eup %859  ;;  %v83_v43 = vmul.f32 1.442695, %v68_v39 }
  0xb5   :  { %v221_v45 = vpop.permute.xlu1 %220  ;;  %682 = vmatprep.mubr.f32.mxu0 %v860_v42  ;;  %v862_v46 = vpop.eup %861 }
  0xb6   :  { %871 = vpow2.f32 %v81_v41  ;;  %vm241_vm0 = vcmp.eq.s32.totalorder %v1116_v44, %v221_v45 }
  0xb7   :  { %873 = vpow2.f32 %v83_v43 }
  0xb8   :  { %v864_v47 = vpop.eup %863 }
  0xb9   :  { %v224_v48 = vpop.permute.xlu1 %223  ;;  %v218_v49 = vpop.permute.xlu0 %217  ;;  %683 = vmatmul.mubr.f32.vlgmr.msra.gmra.mrb[0].mxu0 %v864_v47 }
  0xba   :  { %vm242_vm1 = vcmp.eq.s32.totalorder %v1116_v44, %v224_v48  ;;  %vm240_vm2 = vcmp.eq.s32.totalorder %v1116_v44, %v218_v49  ;;  %v866_v50 = vpop.eup %865  ;;  %815 = vmatpush3.bf16.msra.mxu0 %v943_v1  ;;  %685 = vmatprep.mubr.f32.mxu0 %v862_v46 }
  0xbb   :  { %726 = vmatprep.mubr.msk.f32.mxu1 %vm240_vm2, %v992_v3  ;;  %816 = vmatprep.subr.bf16.mxu0 %v943_v1  ;;  %v389_v3 = vmul.f32 %v381_v63, %v381_v63 }
  0xbc   :  { %727 = vmatmul.mubr.msk.f32.vlgmr.msra.gmra.mrb[0].mxu1 %vm241_vm0, %v1006_v5  ;;  %v868_v51 = vpop.eup %867  ;;  %v380_v5 = vsub.f32 %v1001_v4, %v372_v14 }
  0xbd   :  { %v227_v52 = vpop.permute.xlu1 %226  ;;  %729 = vmatprep.mubr.msk.f32.mxu1 %vm242_vm1, %v987_v2  ;;  %686 = vmatmul.mubr.f32.gmra.mrb[2].mxu0 %v866_v50  ;;  %v870_v54 = vpop.eup %869 }
  0xbe   :  { %vm243_vm3 = vcmp.eq.s32.totalorder %v1116_v44, %v227_v52  ;;  %838 = vmatpush3.bf16.msra.mxu1 %v943_v1  ;;  %817 = vmatpush3.bf16.msra.mxu0 %v943_v1 }
  0xbf   :  { %688 = vmatprep.mubr.f32.mxu0 %v868_v51  ;;  %818 = vmatprep.subr.bf16.mxu0 %v943_v1 }
  0xc0   :  { %730 = vmatmul.mubr.msk.f32.gmra.mrb[2].mxu1 %vm243_vm3, %v1001_v4  ;;  %v872_v55 = vpop.eup %871  ;;  %831 = vmatprep.subr.bf16.mxu1 %v943_v1 }
  0xc1   :  { %v230_v56 = vpop.permute.xlu1 %229  ;;  %689 = vmatmul.mubr.f32.gmra.mrb[4].mxu0 %v870_v54  ;;  %v874_v58 = vpop.eup %873 }
  0xc2   :  { %vm244_vm4 = vcmp.eq.s32.totalorder %v1116_v44, %v230_v56  ;;  %839 = vmatpush3.bf16.msra.mxu1 %v943_v1  ;;  %819 = vmatpush3.bf16.msra.mxu0 %v943_v1 }
  0xc3   :  { %732 = vmatprep.mubr.msk.f32.mxu1 %vm244_vm4, %v1022_v7  ;;  %691 = vmatprep.mubr.f32.mxu0 %v872_v55  ;;  %v371_v7 = vld [vmem:[#allocation2 + $0x10] sm:$0xff] }
  0xc4   :  { %820 = vmatprep.subr.bf16.mxu0 %v943_v1  ;;  %832 = vmatprep.subr.bf16.mxu1 %v943_v1  ;;  %v379_v13 = vsub.f32 %v987_v2, %v371_v7  ;;  %v390_v2 = vmul.f32 %v382_v16, %v382_v16 }
  0xc5   :  { %v233_v59 = vpop.permute.xlu1 %232  ;;  %692 = vmatmul.mubr.f32.gmra.mrb[6].mxu0 %v874_v58 }
  0xc6   :  { %vm245_vm5 = vcmp.eq.s32.totalorder %v1116_v44, %v233_v59  ;;  %840 = vmatpush3.bf16.msra.mxu1 %v943_v1  ;;  %821 = vmatpush3.bf16.msra.mxu0 %v943_v1  ;;  %v387_v22 = vmul.f32 %v379_v13, %v379_v13 }
  0xc7   :  { %733 = vmatmul.mubr.msk.f32.gmra.mrb[4].mxu1 %vm245_vm5, %v1017_v6  ;;  %822 = vmatprep.subr.bf16.mxu0 %v943_v1  ;;  %v388_v6 = vmul.f32 %v380_v5, %v380_v5 }
  0xc8   :  { %833 = vmatprep.subr.bf16.mxu1 %v943_v1  ;;  %770 = vmatprep.mubr.f32.mxu0 %v385_v60 }
  0xc9   :  { %v236_v62 = vpop.permute.xlu1 %235 }
  0xca   :  { %vm246_vm6 = vcmp.eq.s32.totalorder %v1116_v44, %v236_v62  ;;  %841 = vmatpush3.bf16.msra.mxu1 %v943_v1  ;;  %823 = vmatpush3.bf16.msra.mxu0 %v943_v1 }
  0xcb   :  { %735 = vmatprep.mubr.msk.f32.mxu1 %vm246_vm6, %v1038_v9  ;;  %824 = vmatprep.subr.bf16.mxu0 %v943_v1 }
  0xcc   :  { %834 = vmatprep.subr.bf16.mxu1 %v943_v1 }
  0xcd   :  { %v239_v0 = vpop.permute.xlu1 %238 }
  0xce   :  { %vm247_vm7 = vcmp.eq.s32.totalorder %v1116_v44, %v239_v0  ;;  %842 = vmatpush3.bf16.msra.mxu1 %v943_v1  ;;  %825 = vmatpush3.bf16.msra.mxu0 %v943_v1 }
  0xcf   :  { %736 = vmatmul.mubr.msk.f32.gmra.mrb[6].mxu1 %vm247_vm7, %v1033_v8  ;;  %826 = vmatprep.subr.bf16.mxu0 %v943_v1 }
  0xd0   :  { %835 = vmatprep.subr.bf16.mxu1 %v943_v1  ;;  %776 = vmatprep.mubr.f32.mxu1 %v389_v3 }
  0xd2   :  { %843 = vmatpush3.bf16.msra.mxu1 %v943_v1  ;;  %827 = vmatpush3.bf16.msra.mxu0 %v943_v1 }
  0xd3   :  { %836 = vmatprep.subr.bf16.mxu1 %v943_v1  ;;  %828 = vmatprep.subr.bf16.mxu0 %v943_v1 }
  0xd6   :  { %844 = vmatpush3.bf16.msra.mxu1 %v943_v1  ;;  %829 = vmatpush3.bf16.msra.mxu0 %v943_v1 }
  0xd7   :  { %837 = vmatprep.subr.bf16.mxu1 %v943_v1 }
  0xd9   :  { %771 = vmatmul.mubr.f32.vlgmr.msra.gmra.mrb[8].mxu0 %v386_v17 }
  0xda   :  { %845 = vmatpush3.bf16.msra.mxu1 %v943_v1  ;;  %773 = vmatprep.mubr.f32.mxu0 %v387_v22 }
  0xdd   :  { %777 = vmatmul.mubr.f32.vlgmr.msra.gmra.mrb[8].mxu1 %v390_v2  ;;  %774 = vmatmul.mubr.f32.gmra.mrb[10].mxu0 %v388_v6 }
  0xde   :  { %779 = vmatprep.mubr.f32.mxu1 %v391_v26 }
  0xe1   :  { %780 = vmatmul.mubr.f32.gmra.mrb[10].mxu1 %v392_v27 }
 0x18c   :  { %v684_v4 = vpop.f32.mrb[0].mxu0 }
 0x18d   :  { %875 = vlog2.f32 %v684_v4  ;;  %v151_v9 = vpop.f32.mrb[1].mxu0 }
 0x18e   :  { %877 = vlog2.f32 %v151_v9 }
 0x18f   :  { %v728_v28 = vpop.f32.mrb[0].mxu1 }
 0x190   :  { %v322_v29 = vpop.f32.mrb[1].mxu1  ;;  %v687_v32 = vpop.f32.mrb[2].mxu0 }
 0x191   :  { %879 = vlog2.f32 %v687_v32  ;;  %v161_v8 = vpop.f32.mrb[3].mxu0 }
 0x192   :  { %881 = vlog2.f32 %v161_v8 }
 0x193   :  { %v731_v33 = vpop.f32.mrb[2].mxu1 }
 0x194   :  { %v332_v1 = vpop.f32.mrb[3].mxu1  ;;  %v690_v34 = vpop.f32.mrb[4].mxu0 }
 0x195   :  { %883 = vlog2.f32 %v690_v34  ;;  %v171_v35 = vpop.f32.mrb[5].mxu0 }
 0x196   :  { %885 = vlog2.f32 %v171_v35 }
 0x197   :  { %v876_v38 = vpop.eup %875 }
 0x198   :  { %v878_v39 = vpop.eup %877  ;;  %v193_v40 = vmul.f32 0.6931472, %v876_v38  ;;  %v693_v41 = vpop.f32.mrb[6].mxu0 }
 0x199   :  { %v191_v42 = vmul.f32 0.6931472, %v878_v39  ;;  %887 = vlog2.f32 %v693_v41  ;;  %v181_v43 = vpop.f32.mrb[7].mxu0 }
 0x19a   :  { %v734_v45 = vpop.f32.mrb[4].mxu1  ;;  %v207_v46 = vadd.f32 %v193_v40, %v1094_v24  ;;  %889 = vlog2.f32 %v181_v43 }
 0x19b   :  { %v342_v47 = vpop.f32.mrb[5].mxu1  ;;  %v880_v48 = vpop.eup %879  ;;  %v206_v49 = vadd.f32 %v191_v42, %v1086_v19 }
 0x19c   :  { %v882_v50 = vpop.eup %881  ;;  %v197_v51 = vmul.f32 0.6931472, %v880_v48  ;;  %v362_v52 = vsub.f32 %v207_v46, %v728_v28 }
 0x19d   :  { %v195_v53 = vmul.f32 0.6931472, %v882_v50  ;;  %v361_v54 = vsub.f32 %v206_v49, %v322_v29 }
 0x19e   :  { %v500_v55 = vsel %vm498_vm8, %v362_v52, 0.0  ;;  %v209_v56 = vadd.f32 %v197_v51, %v1092_v23  ;;  %v944_v52 = vmov 0.0  }
 0x19f   :  { %v884_v57 = vpop.eup %883  ;;  %v499_v58 = vsel %vm498_vm8, %v361_v54, 0.0  ;;  %v208_v24 = vadd.f32 %v195_v53, %v1084_v18  ;;  %553 = vst [vmem:[#allocation5] sm:$0xff] %v944_v52 }
 0x1a0   :  { %v886_v59 = vpop.eup %885  ;;  %v501_v60 = vadd.f32 %v500_v55, %v499_v58  ;;  %v364_v61 = vsub.f32 %v209_v56, %v731_v33  ;;  %v201_v62 = vmul.f32 0.6931472, %v884_v57 }
 0x1a1   :  { %v363_v63 = vsub.f32 %v208_v24, %v332_v1  ;;  %v199_v19 = vmul.f32 0.6931472, %v886_v59 }
 0x1a2   :  { %v737_v0 = vpop.f32.mrb[6].mxu1  ;;  %v211_v3 = vadd.f32 %v201_v62, %v1100_v30  ;;  %v504_v18 = vsel %vm498_vm8, %v364_v61, 0.0 }
 0x1a3   :  { %v352_v10 = vpop.f32.mrb[7].mxu1  ;;  %v888_v7 = vpop.eup %887  ;;  %v502_v11 = vsel %vm498_vm8, %v363_v63, 0.0  ;;  %v210_v23 = vadd.f32 %v199_v19, %v1102_v31 }
 0x1a4   :  { %v890_v12 = vpop.eup %889  ;;  %v503_v13 = vadd.f32 %v502_v11, %v501_v60  ;;  %v205_v14 = vmul.f32 0.6931472, %v888_v7  ;;  %v366_v15 = vsub.f32 %v211_v3, %v734_v45 }
 0x1a5   :  { %v203_v16 = vmul.f32 0.6931472, %v890_v12  ;;  %v365_v17 = vsub.f32 %v210_v23, %v342_v47 }
 0x1a6   :  { %v505_v5 = vadd.f32 %v504_v18, %v503_v13  ;;  %v213_v20 = vadd.f32 %v205_v14, %v1108_v36  ;;  %v508_v25 = vsel %vm498_vm8, %v366_v15, 0.0 }
 0x1a7   :  { %v506_v21 = vsel %vm498_vm8, %v365_v17, 0.0  ;;  %v212_v30 = vadd.f32 %v203_v16, %v1110_v37 }
 0x1a8   :  { %v507_v22 = vadd.f32 %v506_v21, %v505_v5  ;;  %v368_v2 = vsub.f32 %v213_v20, %v737_v0 }
 0x1a9   :  { %v367_v31 = vsub.f32 %v212_v30, %v352_v10 }
 0x1aa   :  { %v509_v6 = vadd.f32 %v508_v25, %v507_v22  ;;  %v512_v29 = vsel %vm498_vm8, %v368_v2, 0.0 }
 0x1ab   :  { %v510_v26 = vsel %vm498_vm8, %v367_v31, 0.0 }
 0x1ac   :  { %v772_v27 = vpop.f32.mrb[8].mxu0  ;;  %v511_v4 = vadd.f32 %v510_v26, %v509_v6 }
 0x1ad   :  { %v524_v9 = vsel %vm498_vm8, %v772_v27, 0.0  ;;  %v459_v28 = vpop.f32.mrb[9].mxu0 }
 0x1ae   :  { %v523_v36 = vsel %vm498_vm8, %v459_v28, 0.0  ;;  %v513_v32 = vadd.f32 %v512_v29, %v511_v4 }
 0x1af   :  { %v525_v8 = vadd.f32 %v524_v9, %v523_v36 }
 0x1b0   :  { %v778_v37 = vpop.f32.mrb[8].mxu1  ;;  %v775_v33 = vpop.f32.mrb[10].mxu0  ;;  %514 = vadd.xlane.f32.xlu1 %v513_v32 }
 0x1b1   :  { %v479_v1 = vpop.f32.mrb[9].mxu1  ;;  %v469_v34 = vpop.f32.mrb[11].mxu0  ;;  %v528_v40 = vsel %vm498_vm8, %v775_v33, 0.0  ;;  %v532_v46 = vsel %vm498_vm8, %v778_v37, 0.0 }
 0x1b2   :  { %v526_v35 = vsel %vm498_vm8, %v469_v34, 0.0  ;;  %v530_v41 = vsel %vm498_vm8, %v479_v1, 0.0 }
 0x1b3   :  { %v527_v38 = vadd.f32 %v526_v35, %v525_v8 }
 0x1b4   :  { %v781_v39 = vpop.f32.mrb[10].mxu1 }
 0x1b5   :  { %v489_v42 = vpop.f32.mrb[11].mxu1  ;;  %v529_v43 = vadd.f32 %v528_v40, %v527_v38  ;;  %v536_v50 = vsel %vm498_vm8, %v781_v39, 0.0 }
 0x1b6   :  { %v534_v47 = vsel %vm498_vm8, %v489_v42, 0.0 }
 0x1b7   :  { %v531_v45 = vadd.f32 %v530_v41, %v529_v43 }
 0x1b9   :  { %v533_v48 = vadd.f32 %v532_v46, %v531_v45 }
 0x1bb   :  { %v535_v49 = vadd.f32 %v534_v47, %v533_v48 }
 0x1bd   :  { %v537_v51 = vadd.f32 %v536_v50, %v535_v49 }
 0x1bf   :  { %538 = vadd.xlane.f32.xlu0 %v537_v51 }
 0x23d   :  { %v515_v53 = vpop.xlane.xlu1 %514 }
 0x23e   :  { %v516_v54 = vrot.slane %v515_v53, 4 }
 0x240   :  { %v517_v55 = vadd.f32 %v516_v54, %v515_v53 }
 0x242   :  { %v518_v56 = vrot.slane %v517_v55, 2 }
 0x244   :  { %v519_v57 = vadd.f32 %v518_v56, %v517_v55 }
 0x246   :  { %v520_v58 = vrot.slane %v519_v57, 1 }
 0x248   :  { %v521_v24 = vadd.f32 %v520_v58, %v519_v57 }
 0x24a   :  { %846 = vpush %v521_v24 }
 0x24c   :  { %v539_v59 = vpop.xlane.xlu0 %538 }
 0x24d   :  { %v540_v60 = vrot.slane %v539_v59, 4 }
 0x24f   :  { %v541_v61 = vadd.f32 %v540_v60, %v539_v59 }
 0x251   :  { %v542_v62 = vrot.slane %v541_v61, 2 }
 0x253   :  { %v543_v63 = vadd.f32 %v542_v62, %v541_v61 }
 0x255   :  { %v544_v19 = vrot.slane %v543_v63, 1 }
 0x257   :  { %v545_v0 = vadd.f32 %v544_v19, %v543_v63 }
 0x259   :  { %848 = vpush %v545_v0 }
 0x27b   :  { %s847_s1 = spop %846 }
 0x27c   :  { %v551_v10 = vstv %s847_s1 }
 0x28a   :  { %s849_s30 = spop %848 }
 0x28b   :  { %v549_v3 = vstv %s849_s30 }
 0x28c   :  { %v550_v7 = vsel %vm548_vm9, %v549_v3, 0.0 }
 0x28d   :  { %v552_v11 = vsel %vm547_vm10, %v551_v10, %v550_v7 }
 0x28e   :  { %554 = vst [vmem:[#allocation5] sm:$0x1] %v552_v11 }
 0x28f   :  { %924 = shalt.err (!%p921_p12)
}
 0x290   :  { %s925_s7 = scalar_lea.hbm %s1213_s3, 128 }
 0x291   :  { %p926_p13 = scmp.ne.s32.totalorder %s1213_s3, %s925_s7  ;;  %p929_p0 = scmp.lt.u32.totalorder %s925_s7, %s1213_s3 }
 0x293   :  { %p931_p1 = pnand %p929_p0, %p926_p13 }
 0x295   :  { %934 = shalt.err (!%p931_p1)
}
 0x296   :  { %564 = dma.vmem_to_hbm [thread:$0]  %s562_s29, 128, %s1213_s3, [#allocation4]  }
 0x297   :  { %937 = dma.done.wait [#allocation4], 128  }
 0x298   :  { %938 = vsyncadd [#allocation4], 4294967168 }
 0x299   :  { %568 = vsyncpa [#allocation3], 1 }
 0x29a   :  { %569 = vsyncpa [#allocation4], 1 }

</bundles_post_ra>
